<compile_context>
chip_gen: v7x
topology: tpu7x:2x2x1
jax: 0.10.0
libtpu: 0.0.40
codegen_flags: <defaults>
</compile_context>

<pallas_src>
import functools

import jax
import jax.numpy as jnp
from jax.experimental import pallas as pl
from jax.experimental.pallas import tpu as pltpu


def _round_up(v, m):
    return (v + m - 1) // m * m


def _unfold_kernel(x_ref, out_ref, *, k, bc, line_len, stride, zigzag):
    """Extracts one line of `line_len` patches.

    x_ref:   (R, L*bc)            full image, resident in VMEM across the grid
                                  (R = H, lanes = W*B*C for horizontal_seq;
                                   R = W, lanes = H*B*C otherwise)
    out_ref: (line_len, k, k*bc)  this line's patches, lane-dense last axis
    """
    line = pl.program_id(0)
    # Dynamic start only on the (supported) second-minor / sublane dimension.
    rows = pl.ds(line * stride, k)
    if zigzag:
        is_odd = (line % 2) == 1

    # Static, fully-unrolled loop: every lane offset below is a compile-time
    # constant, so all loads/stores are statically addressed on the lane axis.
    for p in range(line_len):
        fwd = x_ref[rows, pl.ds(p * stride * bc, k * bc)]
        if zigzag:
            rev = x_ref[rows, pl.ds((line_len - 1 - p) * stride * bc, k * bc)]
            patch = jnp.where(is_odd, rev, fwd)
        else:
            patch = fwd
        out_ref[p] = patch


def unfolder(x, spatial_kernel_size, stride, horizontal_seq=True, zigzag=False):
    """Pallas equivalent of Unfolder.forward.

    x: (B, C, H, W)  (NCHW, PyTorch convention)
    returns: (B, N, C, k, k) with N = nH * nW, identical semantics to the
    torch module (unfold -> split/squeeze -> optional zigzag flip -> cat ->
    permute(0, 2, 1, 3, 4)).
    """
    B, C, H, W = x.shape
    k, s = int(spatial_kernel_size), int(stride)
    nH = (H - k) // s + 1
    nW = (W - k) // s + 1
    N = nH * nW
    BC = B * C

    if horizontal_seq:
        # rows index H, lanes index (W, B, C): a patch = k rows x (k*B*C) lanes.
        x_t = jnp.transpose(x, (2, 3, 0, 1)).reshape(H, W * BC)
        n_lines, line_len = nH, nW
    else:
        # rows index W, lanes index (H, B, C).
        x_t = jnp.transpose(x, (3, 2, 0, 1)).reshape(W, H * BC)
        n_lines, line_len = nW, nH

    n_rows, n_lanes = x_t.shape
    out_lanes = k * BC
    itemsize = x.dtype.itemsize

    # VMEM budget: resident image (pipeline keeps two buffers even though the
    # constant block index means it is only fetched once) + the double-buffered
    # per-line output block, with generous headroom.
    in_vmem = 2 * _round_up(n_rows, 8) * _round_up(n_lanes, 128) * itemsize
    out_vmem = 2 * line_len * _round_up(k, 8) * _round_up(out_lanes, 128) * itemsize
    vmem_limit = int(max(2 * (in_vmem + out_vmem), 16 * 1024 * 1024))

    # Pure bandwidth-bound copy: read the image once, write all patches once.
    cost = pl.CostEstimate(
        flops=0,
        transcendentals=0,
        bytes_accessed=int((x_t.size + N * k * out_lanes) * itemsize),
    )

    kernel = functools.partial(
        _unfold_kernel, k=k, bc=BC, line_len=line_len, stride=s, zigzag=zigzag
    )

    out3 = pl.pallas_call(
        kernel,
        out_shape=jax.ShapeDtypeStruct((N, k, out_lanes), x.dtype),
        grid=(n_lines,),
        in_specs=[
            # Whole image resident in VMEM; constant block index => one DMA.
            pl.BlockSpec((n_rows, n_lanes), lambda i: (0, 0)),
        ],
        out_specs=pl.BlockSpec((line_len, k, out_lanes), lambda i: (i, 0, 0)),
        compiler_params=pltpu.CompilerParams(
            dimension_semantics=("parallel",),
            vmem_limit_bytes=vmem_limit,
        ),
        cost_estimate=cost,
    )(x_t)

    # (N, k, k*B*C) -> (N, k, k, B, C) is a pure reshape (no data movement);
    # the final permute to the PyTorch layout (B, N, C, k, k) is the only
    # remaining relayout pass and is dictated by the module's output contract.
    out5 = out3.reshape(N, k, k, B, C)
    if horizontal_seq:
        return jnp.transpose(out5, (3, 0, 4, 1, 2))  # (n, kH, kW, b, c) -> (b, n, c, kH, kW)
    return jnp.transpose(out5, (3, 0, 4, 2, 1))      # (n, kW, kH, b, c) -> (b, n, c, kH, kW)


def unfolder_ref(x, k, s, horizontal_seq=True, zigzag=False):
    """Pure-JAX reference reproducing the torch module semantics."""
    B, C, H, W = x.shape
    nH = (H - k) // s + 1
    nW = (W - k) // s + 1
    patches = []
    if horizontal_seq:
        for i in range(nH):
            js = list(range(nW))
            if zigzag and i % 2 == 1:
                js = js[::-1]
            for j in js:
                patches.append(x[:, :, i * s:i * s + k, j * s:j * s + k])
    else:
        for j in range(nW):
            iis = list(range(nH))
            if zigzag and j % 2 == 1:
                iis = iis[::-1]
            for i in iis:
                patches.append(x[:, :, i * s:i * s + k, j * s:j * s + k])
    return jnp.stack(patches, axis=1)  # (B, N, C, k, k)


if __name__ == "__main__":
    key = jax.random.PRNGKey(0)
    B, C, H, W = 2, 4, 16, 16
    x = jax.random.normal(key, (B, C, H, W), dtype=jnp.float32)

    configs = [
        dict(spatial_kernel_size=4, stride=2, horizontal_seq=True, zigzag=True),
        dict(spatial_kernel_size=4, stride=2, horizontal_seq=True, zigzag=False),
        dict(spatial_kernel_size=4, stride=4, horizontal_seq=False, zigzag=False),
        dict(spatial_kernel_size=8, stride=4, horizontal_seq=False, zigzag=True),
    ]
    for cfg in configs:
        out = jax.block_until_ready(unfolder(x, **cfg))
        ref = unfolder_ref(
            x,
            cfg["spatial_kernel_size"],
            cfg["stride"],
            cfg["horizontal_seq"],
            cfg["zigzag"],
        )
        assert out.shape == ref.shape, (out.shape, ref.shape, cfg)
        assert out.dtype == ref.dtype, (out.dtype, ref.dtype, cfg)
        assert jnp.allclose(out, ref), f"mismatch for config {cfg}"

    print("KERNEL_OK")
</pallas_src>

<mosaic_0001>
module attributes {stable_mosaic.version = 11 : i64} {
  func.func @_unfold_kernel(%arg0: i32, %arg1: memref<16x128xf32, #tpu.memory_space<vmem>>, %arg2: memref<7x4x32xf32, #tpu.memory_space<vmem>>) attributes {dimension_semantics = [#tpu.dimension_semantics<parallel>], iteration_bounds = array<i64: 7>, scalar_prefetch = 0 : i64, scratch_operands = 0 : i64, tpu.core_type = #tpu.core_type<tc>, window_params = [{pipeline_mode = #tpu.pipeline_mode<synchronous>, transform_indices = @transform_0, window_bounds = array<i64: 16, 128>}, {transform_indices = @transform_1, window_bounds = array<i64: 7, 4, 32>}]} {
    %c2_i32 = arith.constant 2 : i32
    %0 = arith.muli %arg0, %c2_i32 : i32
    %c2_i32_0 = arith.constant 2 : i32
    %c0_i32 = arith.constant 0 : i32
    %1 = arith.cmpi eq, %c2_i32_0, %c0_i32 : i32
    %c1_i32 = arith.constant 1 : i32
    %2 = arith.select %1, %c1_i32, %c2_i32_0 : i32
    %3 = arith.remsi %arg0, %2 : i32
    %c0_i32_1 = arith.constant 0 : i32
    %4 = arith.cmpi ne, %3, %c0_i32_1 : i32
    %c0_i32_2 = arith.constant 0 : i32
    %5 = arith.cmpi slt, %3, %c0_i32_2 : i32
    %c0_i32_3 = arith.constant 0 : i32
    %6 = arith.cmpi slt, %2, %c0_i32_3 : i32
    %7 = arith.xori %5, %6 : i1
    %8 = arith.andi %7, %4 : i1
    %9 = arith.addi %3, %2 : i32
    %10 = arith.select %8, %9, %3 : i32
    %c1_i32_4 = arith.constant 1 : i32
    %11 = arith.cmpi eq, %10, %c1_i32_4 : i32
    %12 = arith.index_cast %0 : i32 to index
    %c0 = arith.constant 0 : index
    %13 = vector.load %arg1[%12, %c0] : memref<16x128xf32, #tpu.memory_space<vmem>>, vector<4x32xf32>
    %14 = arith.index_cast %0 : i32 to index
    %c96 = arith.constant 96 : index
    %15 = vector.load %arg1[%14, %c96] : memref<16x128xf32, #tpu.memory_space<vmem>>, vector<4x32xf32>
    %16 = arith.select %11, %15, %13 : vector<4x32xf32>
    %c0_5 = arith.constant 0 : index
    %c0_6 = arith.constant 0 : index
    %c0_7 = arith.constant 0 : index
    %17 = vector.load %arg2[%c0_5, %c0_6, %c0_7] : memref<7x4x32xf32, #tpu.memory_space<vmem>>, vector<1x4x32xf32>
    %18 = vector.shape_cast %17 : vector<1x4x32xf32> to vector<4x32xf32>
    %19 = vector.shape_cast %16 : vector<4x32xf32> to vector<1x4x32xf32>
    tpu.vector_store %arg2[%c0_5, %c0_6, %c0_7], %19 {strides = array<i32>} : memref<7x4x32xf32, #tpu.memory_space<vmem>>, vector<1x4x32xf32>,
    %20 = arith.index_cast %0 : i32 to index
    %c16 = arith.constant 16 : index
    %21 = vector.load %arg1[%20, %c16] : memref<16x128xf32, #tpu.memory_space<vmem>>, vector<4x32xf32>
    %22 = arith.index_cast %0 : i32 to index
    %c80 = arith.constant 80 : index
    %23 = vector.load %arg1[%22, %c80] : memref<16x128xf32, #tpu.memory_space<vmem>>, vector<4x32xf32>
    %24 = arith.select %11, %23, %21 : vector<4x32xf32>
    %c1 = arith.constant 1 : index
    %c0_8 = arith.constant 0 : index
    %c0_9 = arith.constant 0 : index
    %25 = vector.load %arg2[%c1, %c0_8, %c0_9] : memref<7x4x32xf32, #tpu.memory_space<vmem>>, vector<1x4x32xf32>
    %26 = vector.shape_cast %25 : vector<1x4x32xf32> to vector<4x32xf32>
    %27 = vector.shape_cast %24 : vector<4x32xf32> to vector<1x4x32xf32>
    tpu.vector_store %arg2[%c1, %c0_8, %c0_9], %27 {strides = array<i32>} : memref<7x4x32xf32, #tpu.memory_space<vmem>>, vector<1x4x32xf32>,
    %28 = arith.index_cast %0 : i32 to index
    %c32 = arith.constant 32 : index
    %29 = vector.load %arg1[%28, %c32] : memref<16x128xf32, #tpu.memory_space<vmem>>, vector<4x32xf32>
    %30 = arith.index_cast %0 : i32 to index
    %c64 = arith.constant 64 : index
    %31 = vector.load %arg1[%30, %c64] : memref<16x128xf32, #tpu.memory_space<vmem>>, vector<4x32xf32>
    %32 = arith.select %11, %31, %29 : vector<4x32xf32>
    %c2 = arith.constant 2 : index
    %c0_10 = arith.constant 0 : index
    %c0_11 = arith.constant 0 : index
    %33 = vector.load %arg2[%c2, %c0_10, %c0_11] : memref<7x4x32xf32, #tpu.memory_space<vmem>>, vector<1x4x32xf32>
    %34 = vector.shape_cast %33 : vector<1x4x32xf32> to vector<4x32xf32>
    %35 = vector.shape_cast %32 : vector<4x32xf32> to vector<1x4x32xf32>
    tpu.vector_store %arg2[%c2, %c0_10, %c0_11], %35 {strides = array<i32>} : memref<7x4x32xf32, #tpu.memory_space<vmem>>, vector<1x4x32xf32>,
    %36 = arith.index_cast %0 : i32 to index
    %c48 = arith.constant 48 : index
    %37 = vector.load %arg1[%36, %c48] : memref<16x128xf32, #tpu.memory_space<vmem>>, vector<4x32xf32>
    %38 = arith.index_cast %0 : i32 to index
    %c48_12 = arith.constant 48 : index
    %39 = vector.load %arg1[%38, %c48_12] : memref<16x128xf32, #tpu.memory_space<vmem>>, vector<4x32xf32>
    %40 = arith.select %11, %39, %37 : vector<4x32xf32>
    %c3 = arith.constant 3 : index
    %c0_13 = arith.constant 0 : index
    %c0_14 = arith.constant 0 : index
    %41 = vector.load %arg2[%c3, %c0_13, %c0_14] : memref<7x4x32xf32, #tpu.memory_space<vmem>>, vector<1x4x32xf32>
    %42 = vector.shape_cast %41 : vector<1x4x32xf32> to vector<4x32xf32>
    %43 = vector.shape_cast %40 : vector<4x32xf32> to vector<1x4x32xf32>
    tpu.vector_store %arg2[%c3, %c0_13, %c0_14], %43 {strides = array<i32>} : memref<7x4x32xf32, #tpu.memory_space<vmem>>, vector<1x4x32xf32>,
    %44 = arith.index_cast %0 : i32 to index
    %c64_15 = arith.constant 64 : index
    %45 = vector.load %arg1[%44, %c64_15] : memref<16x128xf32, #tpu.memory_space<vmem>>, vector<4x32xf32>
    %46 = arith.index_cast %0 : i32 to index
    %c32_16 = arith.constant 32 : index
    %47 = vector.load %arg1[%46, %c32_16] : memref<16x128xf32, #tpu.memory_space<vmem>>, vector<4x32xf32>
    %48 = arith.select %11, %47, %45 : vector<4x32xf32>
    %c4 = arith.constant 4 : index
    %c0_17 = arith.constant 0 : index
    %c0_18 = arith.constant 0 : index
    %49 = vector.load %arg2[%c4, %c0_17, %c0_18] : memref<7x4x32xf32, #tpu.memory_space<vmem>>, vector<1x4x32xf32>
    %50 = vector.shape_cast %49 : vector<1x4x32xf32> to vector<4x32xf32>
    %51 = vector.shape_cast %48 : vector<4x32xf32> to vector<1x4x32xf32>
    tpu.vector_store %arg2[%c4, %c0_17, %c0_18], %51 {strides = array<i32>} : memref<7x4x32xf32, #tpu.memory_space<vmem>>, vector<1x4x32xf32>,
    %52 = arith.index_cast %0 : i32 to index
    %c80_19 = arith.constant 80 : index
    %53 = vector.load %arg1[%52, %c80_19] : memref<16x128xf32, #tpu.memory_space<vmem>>, vector<4x32xf32>
    %54 = arith.index_cast %0 : i32 to index
    %c16_20 = arith.constant 16 : index
    %55 = vector.load %arg1[%54, %c16_20] : memref<16x128xf32, #tpu.memory_space<vmem>>, vector<4x32xf32>
    %56 = arith.select %11, %55, %53 : vector<4x32xf32>
    %c5 = arith.constant 5 : index
    %c0_21 = arith.constant 0 : index
    %c0_22 = arith.constant 0 : index
    %57 = vector.load %arg2[%c5, %c0_21, %c0_22] : memref<7x4x32xf32, #tpu.memory_space<vmem>>, vector<1x4x32xf32>
    %58 = vector.shape_cast %57 : vector<1x4x32xf32> to vector<4x32xf32>
    %59 = vector.shape_cast %56 : vector<4x32xf32> to vector<1x4x32xf32>
    tpu.vector_store %arg2[%c5, %c0_21, %c0_22], %59 {strides = array<i32>} : memref<7x4x32xf32, #tpu.memory_space<vmem>>, vector<1x4x32xf32>,
    %60 = arith.index_cast %0 : i32 to index
    %c96_23 = arith.constant 96 : index
    %61 = vector.load %arg1[%60, %c96_23] : memref<16x128xf32, #tpu.memory_space<vmem>>, vector<4x32xf32>
    %62 = arith.index_cast %0 : i32 to index
    %c0_24 = arith.constant 0 : index
    %63 = vector.load %arg1[%62, %c0_24] : memref<16x128xf32, #tpu.memory_space<vmem>>, vector<4x32xf32>
    %64 = arith.select %11, %63, %61 : vector<4x32xf32>
    %c6 = arith.constant 6 : index
    %c0_25 = arith.constant 0 : index
    %c0_26 = arith.constant 0 : index
    %65 = vector.load %arg2[%c6, %c0_25, %c0_26] : memref<7x4x32xf32, #tpu.memory_space<vmem>>, vector<1x4x32xf32>
    %66 = vector.shape_cast %65 : vector<1x4x32xf32> to vector<4x32xf32>
    %67 = vector.shape_cast %64 : vector<4x32xf32> to vector<1x4x32xf32>
    tpu.vector_store %arg2[%c6, %c0_25, %c0_26], %67 {strides = array<i32>} : memref<7x4x32xf32, #tpu.memory_space<vmem>>, vector<1x4x32xf32>,
    return
  }
  func.func @transform_0(%arg0: i32) -> (i32, i32) {
    %c0_i32 = arith.constant 0 : i32
    %c0_i32_0 = arith.constant 0 : i32
    %c0_i32_1 = arith.constant 0 : i32
    return %c0_i32, %c0_i32_0 : i32, i32
  }
  func.func @transform_1(%arg0: i32) -> (i32, i32, i32) {
    %c0_i32 = arith.constant 0 : i32
    %c0_i32_0 = arith.constant 0 : i32
    %c0_i32_1 = arith.constant 0 : i32
    return %arg0, %c0_i32, %c0_i32_0 : i32, i32, i32
  }
}

</mosaic_0001>

<bundles_post_ra>
// kernel: tpu_custom_call.1
= control target key start
LH: loop header
LB: loop body
LE: loop exit
PB: predicated region body
PF: predicated region fallthrough
CT: control target
= control target key end

     0   :  { %6 = vsyncpa [#allocation3], 0  ;;  %s369_s6 = smov 0   ;;  %s457_s0 = inlined_call_operand.hbm [shape: f32[16,128], index: 0, kind: input, shape index: {}]   ;;  %s458_s1 = inlined_call_operand.vmem [shape: f32[49,4,32], index: 1, kind: output, shape index: {}]  }
   0x1 LB: > { %s375_s7 = sadd.s32 4294967295, %s348_s6   ;;  %p266_p0 = scmp.ge.s32.totalorder %s348_s6, 1  ;;  %s348_s6 = sphi %s369_s6, %s12_s6  }
   0x2   : > { %p64_p1 = scmp.lt.s32.totalorder %s348_s6, 8  ;;  %s350_s8 = smov [#allocation2]  }
   0x3   : > { %s76_s9 = sshll.u32 %s350_s8, 4  ;;  %p459_p3 = scmp.eq.s32.totalorder %s375_s7, 0  ;;  %s77_s9 = int_to_ptr.vmem [resolvable:$true] %s76_s9 }
   0x4   : > { %p379_p2 = pnand %p266_p0, %p64_p1  ;;  %s310_s14 = scalar_lea.hbm %s457_s0, 256 }
   0x5   : > { %p311_p6 = scmp.ne.s32.totalorder %s457_s0, %s310_s14  ;;  %p317_p10 = scmp.lt.u32.totalorder %s310_s14, %s457_s0 }
   0x6   : > { %s461_s10 = scalar_select %p379_p2, 1, 0 }
   0x7   : > { %p287_p4 = pneg %p379_p2 }
   0x9   : > { %p388_p5 = pnand %p459_p3, %p287_p4 }
   0xb   : > { %p312_p7 = pneg %p388_p5 }
   0xd   : > { %p313_p8 = pnand %p312_p7, %p311_p6 }
   0xf   : > { %p314_p9 = pneg %p313_p8 }
  0x11   : > { %p319_p11 = pnand %p317_p10, %p314_p9 }
  0x13   : > { %322 = shalt.err (!%p319_p11)
}
  0x14   : > { %s323_s19 = scalar_lea.vmem %s77_s9, 256  ;;  %p331_p1 = scmp.lt.s32.totalorder %s77_s9, %s77_s9 }
  0x15   : > { %p324_p12 = scmp.ne.s32.totalorder %s77_s9, %s323_s19  ;;  %p332_p4 = scmp.lt.s32.totalorder %s323_s19, %s323_s19 }
  0x17   : > { %p326_p13 = pnand %p324_p12, %p312_p7  ;;  %p333_p3 = por %p332_p4, %p331_p1 }
  0x19   : > { %p327_p0 = pneg %p326_p13 }
  0x1b   : > { %p334_p2 = pnand %p333_p3, %p327_p0 }
  0x1d   : > { %337 = shalt.err (!%p334_p2)
}
  0x1e   : > { %s351_s20 = smov 128   ;;  %s352_s21 = smov 8  }
  0x1f   : > { %290 = dma.hbm_to_vmem [thread:$0]  (!%p388_p5), %s457_s0, 256, %s77_s9, [#allocation3], %s351_s20, %s351_s20, %s352_s21  }
  0x20   : > { %p463_p6 = scmp.ne.s32.totalorder %s461_s10, 0 }
  0x21   : > { %p464_p8 = scmp.eq.s32.totalorder (!%p463_p6), %s375_s7, 0 }
  0x22   : > { %92 = sbr.rel (%p463_p6) target bundleno = 285 (0x11d), region = 24 }
  0x29   : > { %343 = dma.done.wait (%p464_p8), [#allocation3], 256   ;;  %p465_p7 = pmov %p464_p8 }
  0x2a   : > { %s271_s24 = sshll.u32 %s375_s7, 1  ;;  %s353_s26 = smov 96   ;;  %vm141_vm1 = vcmask 257024  }
  0x2b   : > { %345 = vsyncadd (%p465_p7), [#allocation3], 4294967040  ;;  %s127_s25 = scalar_lea.vmem [#allocation2], %s271_s24  ;;  %s354_s27 = smov 32  }
  0x2c   : > { %v128_v0 = vld [vmem:[%s127_s25] sm:$0xf]  ;;  %s355_s28 = smov 64   ;;  %s356_s29 = smov 80  }
  0x2d   : > { %v155_v1 = vld [vmem:[%s127_s25] sm:$0xf]  ;;  %133 = vrot.lane.b32.xlu0 %v128_v0, %s353_s26  ;;  %s115_s30 = ssub.s32 0, %s375_s7  ;;  %p114_p2 = scmp.lt.s32.totalorder %s375_s7, 0 }
  0x2e   : > { %157 = vrot.lane.b32.xlu1 %v155_v1, %s354_s27  ;;  %v143_v2 = vld [vmem:[%s127_s25] sm:$0xf]  ;;  %s272_s2 = smin.u32 %s375_s7, %s115_s30  ;;  %s107_s9 = smul.u32 7, %s375_s7 }
  0x2f   : > { %v174_v3 = vld [vmem:[%s127_s25] sm:$0xf]  ;;  %s117_s3 = sand.u32 1, %s272_s2   ;;  %s357_s10 = smov 48  }
  0x30   : > { %v186_v4 = vld [vmem:[%s127_s25] sm:$0xf]  ;;  %s118_s4 = ssub.s32 0, %s117_s3  ;;  %p108_p9 = scmp.lt.s32.totalorder %s107_s9, 48 }
  0x31   : > { %145 = vrot.lane.b32.xlu0 %v143_v2, %s355_s28  ;;  %v198_v5 = vld [vmem:[%s127_s25] sm:$0xf]  ;;  %s469_s4 = smov (!%p114_p2, %s118_s4), %s117_s3  ;;  %s358_s14 = smov 112  }
  0x32   : > { %176 = vrot.lane.b32.xlu1 %v174_v3, %s353_s26  ;;  %v167_v6 = vld [vmem:[%s127_s25] sm:$0xf]  ;;  %p274_p3 = scmp.lt.s32.totalorder %s469_s4, 0  ;;  %s124_s5 = sadd.s32 2, %s469_s4 }
  0x33   : > { %s473_s9 = smov (!%p108_p9, %s107_s9), 48 }
  0x34   : > { %s471_s5 = smov (!%p274_p3, %s124_s5), %s469_s4  ;;  %s270_s7 = sshll.u32 %s473_s9, 2 }
  0x35   : > { %188 = vrot.lane.b32.xlu0 %v186_v4, %s355_s28  ;;  %p126_p5 = scmp.eq.s32.totalorder %s471_s5, 1  ;;  %s111_s13 = scalar_lea.vmem %s458_s1, %s270_s7 }
  0x36   : > { %200 = vrot.lane.b32.xlu1 %v198_v5, %s354_s27 }
  0x37   : > { %s129_s8 = scalar_select %p126_p5, 1, 0 }
  0x39   : > { %v130_v7 = vstv %s129_s8 }
  0x3a   : > { %169 = vrot.lane.b32.xlu1 %v167_v6, %s356_s29  ;;  %vm425_vm0 = vcmp.eq.s32.totalorder %v130_v7, 1 }
  0x9f   : > { %v134_v9 = vpop.permute.xlu0 %133 }
  0xa0   : > { %v158_v10 = vpop.permute.xlu1 %157  ;;  %v136_v11 = vsel %vm425_vm0, %v128_v0, %v134_v9 }
  0xa1   : > { %138 = vrot.lane.b32.xlu0 %v136_v11, %s354_s27  ;;  %v160_v12 = vsel %vm425_vm0, %v155_v1, %v158_v10 }
  0xa3   : > { %v146_v13 = vpop.permute.xlu0 %145 }
  0xa4   : > { %v177_v14 = vpop.permute.xlu1 %176  ;;  %v148_v15 = vsel %vm425_vm0, %v143_v2, %v146_v13 }
  0xa5   : > { %162 = vrot.lane.b32.xlu0 %v160_v12, %s355_s28  ;;  %150 = vrot.lane.b32.xlu1 %v148_v15, %s357_s10  ;;  %v179_v16 = vsel %vm425_vm0, %v174_v3, %v177_v14 }
  0xa7   : > { %v189_v17 = vpop.permute.xlu0 %188 }
  0xa8   : > { %v201_v18 = vpop.permute.xlu1 %200  ;;  %v191_v19 = vsel %vm425_vm0, %v186_v4, %v189_v17 }
  0xa9   : > { %v203_v20 = vsel %vm425_vm0, %v198_v5, %v201_v18  ;;  %181 = vrot.lane.b32.xlu0 %v179_v16, %s353_s26  ;;  %193 = vrot.lane.b32.xlu1 %v191_v19, %s358_s14 }
  0xaa   : > { %280 = vst.msk [vmem:[%s111_s13 + $0x18] sm:$0xf] %vm141_vm1, %v203_v20 }
  0xac   : > { %v170_v21 = vpop.permute.xlu1 %169 }
  0xad   : > { %277 = vst.msk [vmem:[%s111_s13 + $0xc] sm:$0xf] %vm141_vm1, %v170_v21 }
 0x113   : > { %v139_v22 = vpop.permute.xlu0 %138 }
 0x114   : > { %142 = vst.msk [vmem:[%s111_s13] sm:$0xf] %vm141_vm1, %v139_v22 }
 0x117   : > { %v151_v23 = vpop.permute.xlu1 %150  ;;  %v163_v24 = vpop.permute.xlu0 %162 }
 0x118   : > { %275 = vst.msk [vmem:[%s111_s13 + $0x4] sm:$0xf] %vm141_vm1, %v151_v23  ;;  %276 = vst.msk [vmem:[%s111_s13 + $0x8] sm:$0xf] %vm141_vm1, %v163_v24 }
 0x11b   : > { %v194_v25 = vpop.permute.xlu1 %193  ;;  %v182_v26 = vpop.permute.xlu0 %181 }
 0x11c   : > { %279 = vst.msk [vmem:[%s111_s13 + $0x14] sm:$0xf] %vm141_vm1, %v194_v25  ;;  %278 = vst.msk [vmem:[%s111_s13 + $0x10] sm:$0xf] %vm141_vm1, %v182_v26 }
 0x11d PF: > { %s12_s6 = sadd.s32 1, %s348_s6  }
 0x11e   : > { %p9_p10 = scmp.ge.s32.totalorder %s12_s6, 9  }
 0x120   :  { %11 = sbr.rel (!%p9_p10) target bundleno = 1 (0x1), region = 63 }
 0x127   :  { %228 = vsyncpa [#allocation3], 1 }
 0x128   :  { %230 = vsyncpa [#allocation3 + $0x1], 1 }

</bundles_post_ra>
